<compile_context>
chip_gen: v6e
topology: v6e:2x2x1
jax: 0.10.0
libtpu: 0.0.40
codegen_flags: <defaults>
</compile_context>

<pallas_src>
from functools import partial

import jax
import jax.numpy as jnp
from jax.experimental import pallas as pl
from jax.experimental.pallas import tpu as pltpu

NUM_CLASSES = 10
NUM_CARDS = 6
FC_PAD = 128  # pad classes to a lane-dense 128


def _pick_tile(dim, prefs=(256, 128)):
    """Largest preferred tile that divides dim, else the full dim (valid BlockSpec)."""
    for p in prefs:
        if dim % p == 0:
            return p
    return dim


# --------------------------------------------------------------------------
# Batched tiled matmul kernel with fused BN scale/bias (+ residual) (+ ReLU)
# --------------------------------------------------------------------------
def _bmm_body(a_ref, b_ref, s_ref, c_ref, r_ref, o_ref, acc_ref, relu, fuse_add):
    k = pl.program_id(3)

    @pl.when(k == 0)
    def _():
        acc_ref[...] = jnp.zeros_like(acc_ref)

    acc_ref[...] += jnp.dot(a_ref[0], b_ref[0], preferred_element_type=jnp.float32)

    @pl.when(k == pl.num_programs(3) - 1)
    def _():
        acc = acc_ref[...] * s_ref[0] + c_ref[0]          # f32 epilogue (v5e-safe)
        if fuse_add:
            acc = acc + r_ref[0].astype(jnp.float32)      # fused residual add
        if relu:
            acc = jnp.maximum(acc, 0.0)
        o_ref[0] = acc.astype(o_ref.dtype)


def _make_bmm_kernel(relu, fuse_add):
    if fuse_add:
        def kernel(a_ref, b_ref, s_ref, c_ref, r_ref, o_ref, acc_ref):
            _bmm_body(a_ref, b_ref, s_ref, c_ref, r_ref, o_ref, acc_ref, relu, True)
    else:
        def kernel(a_ref, b_ref, s_ref, c_ref, o_ref, acc_ref):
            _bmm_body(a_ref, b_ref, s_ref, c_ref, None, o_ref, acc_ref, relu, False)
    return kernel


@partial(jax.jit, static_argnames=("relu", "fuse_add", "out_dtype"))
def batched_matmul_scale_bias(a, b, scale, bias, residual=None, *,
                              relu=False, fuse_add=False, out_dtype=jnp.bfloat16):
    """Per-card (C,M,K)@(C,K,N) * scale(C,1,N) + bias(C,1,N) [+residual] [ReLU]."""
    C, M, K = a.shape
    _, _, N = b.shape
    tm, tn, tk = _pick_tile(M), _pick_tile(N), _pick_tile(K)
    grid = (C, M // tm, N // tn, K // tk)

    in_specs = [
        pl.BlockSpec((1, tm, tk), lambda c, i, j, k: (c, i, k)),
        pl.BlockSpec((1, tk, tn), lambda c, i, j, k: (c, k, j)),
        pl.BlockSpec((1, 1, tn), lambda c, i, j, k: (c, 0, j)),
        pl.BlockSpec((1, 1, tn), lambda c, i, j, k: (c, 0, j)),
    ]
    args = [a, b, scale, bias]
    if fuse_add:
        in_specs.append(pl.BlockSpec((1, tm, tn), lambda c, i, j, k: (c, i, j)))
        args.append(residual)

    return pl.pallas_call(
        _make_bmm_kernel(relu, fuse_add),
        out_shape=jax.ShapeDtypeStruct((C, M, N), out_dtype),
        grid=grid,
        in_specs=in_specs,
        out_specs=pl.BlockSpec((1, tm, tn), lambda c, i, j, k: (c, i, j)),
        scratch_shapes=[pltpu.VMEM((tm, tn), jnp.float32)],
        compiler_params=pltpu.CompilerParams(
            dimension_semantics=("parallel", "parallel", "parallel", "arbitrary"),
            vmem_limit_bytes=32 * 1024 * 1024,
        ),
    )(*args)


# --------------------------------------------------------------------------
# Global average pool (per card, tiled over channels)
# --------------------------------------------------------------------------
def _gap_kernel(x_ref, o_ref):
    o_ref[0] = jnp.mean(x_ref[0].astype(jnp.float32), axis=1).astype(o_ref.dtype)


@jax.jit
def global_avg_pool(x):
    """x: [cards, Nb, HW, C] -> [cards, Nb, C] (mean over spatial)."""
    cards, Nb, HW, C = x.shape
    tc = _pick_tile(C)
    return pl.pallas_call(
        _gap_kernel,
        out_shape=jax.ShapeDtypeStruct((cards, Nb, C), x.dtype),
        grid=(cards, C // tc),
        in_specs=[pl.BlockSpec((1, Nb, HW, tc), lambda c, j: (c, 0, 0, j))],
        out_specs=pl.BlockSpec((1, Nb, tc), lambda c, j: (c, 0, j)),
        compiler_params=pltpu.CompilerParams(
            dimension_semantics=("parallel", "parallel")),
    )(x)


# --------------------------------------------------------------------------
# Per-card softmax + ensemble mean (tiny tensor)
# --------------------------------------------------------------------------
def _softmax_mean_kernel(x_ref, o_ref):
    x = x_ref[...]
    x = x - jnp.max(x, axis=-1, keepdims=True)
    e = jnp.exp(x)
    p = e / jnp.sum(e, axis=-1, keepdims=True)
    o_ref[...] = jnp.mean(p, axis=0)


@jax.jit
def softmax_mean(logits):
    """logits: [cards, N, classes] -> mean over cards of per-card softmax."""
    K, N, C = logits.shape
    return pl.pallas_call(
        _softmax_mean_kernel,
        out_shape=jax.ShapeDtypeStruct((N, C), jnp.float32),
        grid=(1,),
        in_specs=[pl.BlockSpec((K, N, C), lambda i: (0, 0, 0))],
        out_specs=pl.BlockSpec((N, C), lambda i: (0, 0)),
        compiler_params=pltpu.CompilerParams(dimension_semantics=("arbitrary",)),
    )(logits)


# --------------------------------------------------------------------------
# Plain-JAX glue: im2col (bf16), conv wrapper, ResNet deck forward
# --------------------------------------------------------------------------
def im2col(x, kh, kw, stride, padding):
    """x: [cards, Nb, H, W, C] -> [cards, Nb*OH*OW, kh*kw*C] (patch order (kh,kw,C))."""
    cards, Nb, H, W, C = x.shape
    if padding:
        x = jnp.pad(x, ((0, 0), (0, 0), (padding, padding), (padding, padding), (0, 0)))
    OH = (H + 2 * padding - kh) // stride + 1
    OW = (W + 2 * padding - kw) // stride + 1
    cols = []
    for i in range(kh):
        for j in range(kw):
            cols.append(x[:, :, i:i + stride * OH:stride, j:j + stride * OW:stride, :])
    patches = jnp.concatenate(cols, axis=-1)
    return patches.reshape(cards, Nb * OH * OW, kh * kw * C), OH, OW


def conv_layer(x, p, stride, relu, residual=None, out_dtype=jnp.bfloat16):
    """Conv (no bias) + folded eval BN (+ fused residual add + ReLU).  x: [cards,Nb,H,W,C]."""
    cards, Nb, H, W, Cin = x.shape
    K = p["w"].shape[1]
    kh = 1 if K == Cin else 3
    pad = 1 if kh == 3 else 0
    if kh == 1:
        xs = x[:, :, ::stride, ::stride, :] if stride != 1 else x
        OH, OW = xs.shape[2], xs.shape[3]
        patches = xs.reshape(cards, Nb * OH * OW, Cin)
    else:
        patches, OH, OW = im2col(x, kh, kh, stride, pad)
    res2d = None
    if residual is not None:
        res2d = residual.reshape(cards, Nb * OH * OW, residual.shape[-1])
    out = batched_matmul_scale_bias(
        patches, p["w"], p["scale"], p["bias"], residual=res2d,
        relu=relu, fuse_add=residual is not None, out_dtype=out_dtype)
    return out.reshape(cards, Nb, OH, OW, -1)


def basic_block(x, blk, stride):
    h = conv_layer(x, blk["conv1"], stride, relu=True)
    if "shortcut" in blk:
        sc = conv_layer(x, blk["shortcut"], stride, relu=False)
    else:
        sc = x
    # residual add + ReLU fused into conv2's matmul epilogue
    return conv_layer(h, blk["conv2"], 1, relu=True, residual=sc)


@jax.jit
def card_deck_forward(x_nchw, deck, mu):
    """Equivalent of Diffenderfer2021CARD_Deck.forward (all 6 cards batched)."""
    # NCHW -> NHWC; mu is subtracted here (fuses with the transpose); the 1/sigma
    # factor of the input normalization is folded into the stem conv weights.
    x = jnp.transpose(x_nchw, (0, 2, 3, 1)) - mu
    x = jnp.broadcast_to(x[None], (NUM_CARDS,) + x.shape).astype(jnp.bfloat16)
    x = conv_layer(x, deck["stem"], stride=1, relu=True)
    for si, stage in enumerate(deck["stages"]):
        for bi, blk in enumerate(stage):
            stride = 2 if (si > 0 and bi == 0) else 1
            x = basic_block(x, blk, stride)
    cards, Nb, H, W, C = x.shape
    feat = global_avg_pool(x.reshape(cards, Nb, H * W, C))
    logits = batched_matmul_scale_bias(
        feat, deck["fc_w"], deck["fc_scale"], deck["fc_b"],
        relu=False, out_dtype=jnp.float32)[:, :, :NUM_CLASSES]
    return softmax_mean(logits)


# --------------------------------------------------------------------------
# Deterministic parameter construction (per-card, then stacked across cards)
# --------------------------------------------------------------------------
def make_conv_bn(key, kh, kw, cin, cout):
    k1, k2, k3, k4, k5 = jax.random.split(key, 5)
    fan_in = kh * kw * cin
    w = jax.random.normal(k1, (kh, kw, cin, cout), jnp.float32) * (1.0 / fan_in ** 0.5)
    gamma = jax.random.uniform(k2, (cout,), jnp.float32, 0.8, 1.2)
    beta = jax.random.normal(k3, (cout,), jnp.float32) * 0.05
    mean = jax.random.normal(k4, (cout,), jnp.float32) * 0.05
    var = jax.random.uniform(k5, (cout,), jnp.float32, 0.5, 1.5)
    scale = gamma / jnp.sqrt(var + 1e-5)       # eval-mode BN folded into conv epilogue
    bias = beta - mean * scale
    return {"w": w, "scale": scale, "bias": bias}


def make_card_params(key, width):
    keys = iter(jax.random.split(key, 64))
    params = {"stem": make_conv_bn(next(keys), 3, 3, 3, width)}
    stages = []
    cin = width
    for cout, stride in [(width, 1), (2 * width, 2), (4 * width, 2), (8 * width, 2)]:
        blocks = []
        for b in range(2):
            s = stride if b == 0 else 1
            blk = {"conv1": make_conv_bn(next(keys), 3, 3, cin, cout),
                   "conv2": make_conv_bn(next(keys), 3, 3, cout, cout)}
            if s != 1 or cin != cout:
                blk["shortcut"] = make_conv_bn(next(keys), 1, 1, cin, cout)
            blocks.append(blk)
            cin = cout
        stages.append(blocks)
    params["stages"] = stages
    kfc1, kfc2 = jax.random.split(next(keys))
    params["fc_w"] = jax.random.normal(kfc1, (8 * width, NUM_CLASSES), jnp.float32) * (1.0 / (8 * width) ** 0.5)
    params["fc_b"] = jax.random.normal(kfc2, (NUM_CLASSES,), jnp.float32) * 0.05
    return params


def _stack_conv(raw_cards, getter, fold_sigma=None):
    ws, ss, bs = [], [], []
    for rc in raw_cards:
        p = getter(rc)
        w = p["w"]                                # [kh, kw, cin, cout]
        if fold_sigma is not None:
            w = w / fold_sigma[None, None, :, None]   # fold input 1/sigma into stem
        ws.append(w.reshape(-1, w.shape[-1]))
        ss.append(p["scale"][None, :])
        bs.append(p["bias"][None, :])
    return {"w": jnp.stack(ws).astype(jnp.bfloat16),
            "scale": jnp.stack(ss).astype(jnp.float32),
            "bias": jnp.stack(bs).astype(jnp.float32)}


def make_deck_params(key, width, sigma):
    card_keys = jax.random.split(key, NUM_CARDS)
    raw = [make_card_params(k, width) for k in card_keys]

    deck = {"stem": _stack_conv(raw, lambda rc: rc["stem"], fold_sigma=sigma)}
    stages = []
    for si in range(len(raw[0]["stages"])):
        blocks = []
        for bi in range(len(raw[0]["stages"][si])):
            blk = {"conv1": _stack_conv(raw, lambda rc: rc["stages"][si][bi]["conv1"]),
                   "conv2": _stack_conv(raw, lambda rc: rc["stages"][si][bi]["conv2"])}
            if "shortcut" in raw[0]["stages"][si][bi]:
                blk["shortcut"] = _stack_conv(raw, lambda rc: rc["stages"][si][bi]["shortcut"])
            blocks.append(blk)
        stages.append(blocks)
    deck["stages"] = stages

    # FC, padded to 128 classes for lane-dense output stores.
    fws, fbs = [], []
    for rc in raw:
        fw = jnp.zeros((rc["fc_w"].shape[0], FC_PAD), jnp.float32).at[:, :NUM_CLASSES].set(rc["fc_w"])
        fb = jnp.zeros((1, FC_PAD), jnp.float32).at[0, :NUM_CLASSES].set(rc["fc_b"])
        fws.append(fw)
        fbs.append(fb)
    deck["fc_w"] = jnp.stack(fws).astype(jnp.bfloat16)
    deck["fc_b"] = jnp.stack(fbs).astype(jnp.float32)
    deck["fc_scale"] = jnp.ones((NUM_CARDS, 1, FC_PAD), jnp.float32)
    return deck


# --------------------------------------------------------------------------
# Main
# --------------------------------------------------------------------------
if __name__ == "__main__":
    key = jax.random.PRNGKey(0)
    kx, kp = jax.random.split(key)

    # Small shapes consistent with the module: batch=2, 3 channels, 16x16 spatial.
    x = jax.random.uniform(kx, (2, 3, 16, 16), jnp.float32)
    width = 8  # small stand-in for production width=128

    mu = jnp.array([0.491, 0.482, 0.447], jnp.float32)
    sigma = jnp.array([0.247, 0.243, 0.262], jnp.float32)

    deck = make_deck_params(kp, width, sigma)

    out = card_deck_forward(x, deck, mu)
    out = jax.block_until_ready(out)

    assert out.shape == (2, NUM_CLASSES), out.shape
    # Mean of softmaxes: each row must sum to 1 and lie in [0, 1].
    assert bool(jnp.allclose(jnp.sum(out, axis=-1), 1.0, atol=1e-4)), jnp.sum(out, axis=-1)
    assert bool(jnp.all(out >= 0.0)) and bool(jnp.all(out <= 1.0))

    print("KERNEL_OK")
</pallas_src>

<mosaic_0001>
module attributes {stable_mosaic.version = 11 : i64} {
  func.func @kernel(%arg0: i32, %arg1: i32, %arg2: i32, %arg3: i32, %arg4: memref<1x256x27xbf16, #tpu.memory_space<vmem>>, %arg5: memref<1x27x8xbf16, #tpu.memory_space<vmem>>, %arg6: memref<1x1x8xf32, #tpu.memory_space<vmem>>, %arg7: memref<1x1x8xf32, #tpu.memory_space<vmem>>, %arg8: memref<1x256x8xbf16, #tpu.memory_space<vmem>>, %arg9: memref<256x8xf32, #tpu.memory_space<vmem>>) attributes {dimension_semantics = [#tpu.dimension_semantics<parallel>, #tpu.dimension_semantics<parallel>, #tpu.dimension_semantics<parallel>, #tpu.dimension_semantics<arbitrary>], iteration_bounds = array<i64: 6, 2, 1, 1>, scalar_prefetch = 0 : i64, scratch_operands = 1 : i64, tpu.core_type = #tpu.core_type<tc>, window_params = [{transform_indices = @transform_0, window_bounds = array<i64: 1, 256, 27>}, {transform_indices = @transform_1, window_bounds = array<i64: 1, 27, 8>}, {transform_indices = @transform_2, window_bounds = array<i64: 1, 1, 8>}, {transform_indices = @transform_3, window_bounds = array<i64: 1, 1, 8>}, {transform_indices = @transform_4, window_bounds = array<i64: 1, 256, 8>}]} {
    %c0_i32 = arith.constant 0 : i32
    %0 = arith.cmpi eq, %arg3, %c0_i32 : i32
    %1 = arith.extui %0 : i1 to i32
    %c0_i32_0 = arith.constant 0 : i32
    %2 = arith.cmpi ne, %1, %c0_i32_0 : i32
    scf.if %2 {
      %cst_12 = arith.constant 0.000000e+00 : f32
      %14 = vector.broadcast %cst_12 : f32 to vector<256x8xf32>
      %c0_13 = arith.constant 0 : index
      %c0_14 = arith.constant 0 : index
      %15 = vector.load %arg9[%c0_13, %c0_14] : memref<256x8xf32, #tpu.memory_space<vmem>>, vector<256x8xf32>
      tpu.vector_store %arg9[%c0_13, %c0_14], %14 {strides = array<i32>} : memref<256x8xf32, #tpu.memory_space<vmem>>, vector<256x8xf32>,
    } else {
    }
    %c0 = arith.constant 0 : index
    %c0_1 = arith.constant 0 : index
    %3 = vector.load %arg9[%c0, %c0_1] : memref<256x8xf32, #tpu.memory_space<vmem>>, vector<256x8xf32>
    %c0_2 = arith.constant 0 : index
    %c0_3 = arith.constant 0 : index
    %c0_4 = arith.constant 0 : index
    %4 = vector.load %arg4[%c0_2, %c0_3, %c0_4] : memref<1x256x27xbf16, #tpu.memory_space<vmem>>, vector<1x256x27xbf16>
    %5 = vector.shape_cast %4 : vector<1x256x27xbf16> to vector<256x27xbf16>
    %c0_5 = arith.constant 0 : index
    %c0_6 = arith.constant 0 : index
    %c0_7 = arith.constant 0 : index
    %6 = vector.load %arg5[%c0_5, %c0_6, %c0_7] : memref<1x27x8xbf16, #tpu.memory_space<vmem>>, vector<1x27x8xbf16>
    %7 = vector.shape_cast %6 : vector<1x27x8xbf16> to vector<27x8xbf16>
    %cst = arith.constant dense<0.000000e+00> : vector<256x8xf32>
    %8 = tpu.matmul %5, %7, %cst {dimension_numbers = #tpu.dot_dimension_numbers<[1], [0], [0], [1], [0, 0, 1, 1], [], []>} : vector<256x27xbf16>, vector<27x8xbf16>, vector<256x8xf32> -> vector<256x8xf32>
    %9 = arith.addf %3, %8 : vector<256x8xf32>
    %c0_8 = arith.constant 0 : index
    %c0_9 = arith.constant 0 : index
    %10 = vector.load %arg9[%c0_8, %c0_9] : memref<256x8xf32, #tpu.memory_space<vmem>>, vector<256x8xf32>
    tpu.vector_store %arg9[%c0_8, %c0_9], %9 {strides = array<i32>} : memref<256x8xf32, #tpu.memory_space<vmem>>, vector<256x8xf32>,
    %c0_i32_10 = arith.constant 0 : i32
    %11 = arith.cmpi eq, %arg3, %c0_i32_10 : i32
    %12 = arith.extui %11 : i1 to i32
    %c0_i32_11 = arith.constant 0 : i32
    %13 = arith.cmpi ne, %12, %c0_i32_11 : i32
    scf.if %13 {
      %c0_12 = arith.constant 0 : index
      %c0_13 = arith.constant 0 : index
      %14 = vector.load %arg9[%c0_12, %c0_13] : memref<256x8xf32, #tpu.memory_space<vmem>>, vector<256x8xf32>
      %c0_14 = arith.constant 0 : index
      %c0_15 = arith.constant 0 : index
      %c0_16 = arith.constant 0 : index
      %15 = vector.load %arg6[%c0_14, %c0_15, %c0_16] : memref<1x1x8xf32, #tpu.memory_space<vmem>>, vector<1x1x8xf32>
      %16 = vector.shape_cast %15 : vector<1x1x8xf32> to vector<1x8xf32>
      %17 = vector.broadcast %16 : vector<1x8xf32> to vector<256x8xf32>
      %18 = arith.mulf %14, %17 : vector<256x8xf32>
      %c0_17 = arith.constant 0 : index
      %c0_18 = arith.constant 0 : index
      %c0_19 = arith.constant 0 : index
      %19 = vector.load %arg7[%c0_17, %c0_18, %c0_19] : memref<1x1x8xf32, #tpu.memory_space<vmem>>, vector<1x1x8xf32>
      %20 = vector.shape_cast %19 : vector<1x1x8xf32> to vector<1x8xf32>
      %21 = vector.broadcast %20 : vector<1x8xf32> to vector<256x8xf32>
      %22 = arith.addf %18, %21 : vector<256x8xf32>
      %cst_20 = arith.constant 0.000000e+00 : f32
      %23 = vector.broadcast %cst_20 : f32 to vector<256x8xf32>
      %24 = arith.maximumf %22, %23 : vector<256x8xf32>
      %25 = arith.truncf %24 : vector<256x8xf32> to vector<256x8xbf16>
      %c0_21 = arith.constant 0 : index
      %c0_22 = arith.constant 0 : index
      %c0_23 = arith.constant 0 : index
      %26 = vector.load %arg8[%c0_21, %c0_22, %c0_23] : memref<1x256x8xbf16, #tpu.memory_space<vmem>>, vector<1x256x8xbf16>
      %27 = vector.shape_cast %26 : vector<1x256x8xbf16> to vector<256x8xbf16>
      %28 = vector.shape_cast %25 : vector<256x8xbf16> to vector<1x256x8xbf16>
      tpu.vector_store %arg8[%c0_21, %c0_22, %c0_23], %28 {strides = array<i32>} : memref<1x256x8xbf16, #tpu.memory_space<vmem>>, vector<1x256x8xbf16>,
    } else {
    }
    return
  }
  func.func @transform_0(%arg0: i32, %arg1: i32, %arg2: i32, %arg3: i32) -> (i32, i32, i32) {
    %c0_i32 = arith.constant 0 : i32
    return %arg0, %arg1, %arg3 : i32, i32, i32
  }
  func.func @transform_1(%arg0: i32, %arg1: i32, %arg2: i32, %arg3: i32) -> (i32, i32, i32) {
    %c0_i32 = arith.constant 0 : i32
    return %arg0, %arg3, %arg2 : i32, i32, i32
  }
  func.func @transform_2(%arg0: i32, %arg1: i32, %arg2: i32, %arg3: i32) -> (i32, i32, i32) {
    %c0_i32 = arith.constant 0 : i32
    %c0_i32_0 = arith.constant 0 : i32
    return %arg0, %c0_i32, %arg2 : i32, i32, i32
  }
  func.func @transform_3(%arg0: i32, %arg1: i32, %arg2: i32, %arg3: i32) -> (i32, i32, i32) {
    %c0_i32 = arith.constant 0 : i32
    %c0_i32_0 = arith.constant 0 : i32
    return %arg0, %c0_i32, %arg2 : i32, i32, i32
  }
  func.func @transform_4(%arg0: i32, %arg1: i32, %arg2: i32, %arg3: i32) -> (i32, i32, i32) {
    %c0_i32 = arith.constant 0 : i32
    return %arg0, %arg1, %arg2 : i32, i32, i32
  }
}

</mosaic_0001>

<bundles_post_ra>
// kernel: batched_matmul_scale_bias.1
= control target key start
LH: loop header
LB: loop body
LE: loop exit
PB: predicated region body
PF: predicated region fallthrough
CT: control target
= control target key end

     0   :  { %s1607_s15 = smov 0   ;;  %s1609_s16 = smov 0   ;;  %s1950_s0 = inlined_call_operand.vmem [shape: bf16[6,512,27], index: 0, kind: input, shape index: {}]   ;;  %s1951_s1 = inlined_call_operand.vmem [shape: bf16[6,27,8], index: 1, kind: input, shape index: {}]   ;;  %s1952_s2 = inlined_call_operand.vmem [shape: f32[6,1,8], index: 2, kind: input, shape index: {}]   ;;  %s1953_s3 = inlined_call_operand.vmem [shape: f32[6,1,8], index: 3, kind: input, shape index: {}]   ;;  %s1954_s4 = inlined_call_operand.vmem [shape: bf16[6,512,8], index: 4, kind: output, shape index: {}]  }
   0x1   :  { %s1611_s17 = smov 0   ;;  %s1613_s18 = smov 0  }
   0x2   :  { %s1615_s19 = smov 0  }
   0x3 LB: > { %s36_s20 = sadd.s32 1, %s1570_s17  ;;  %s40_s21 = sadd.s32 1, %s1574_s18  ;;  %s1578_s19 = sphi %s1615_s19, %s14_s19   ;;  %s1574_s18 = sphi %s1613_s18, %s1959_s18   ;;  %s1570_s17 = sphi %s1611_s17, %s1958_s17   ;;  %s1566_s16 = sphi %s1609_s16, %s1957_s16   ;;  %s1562_s15 = sphi %s1607_s15, %s1956_s15  }
   0x4   : > { %p38_p0 = scmp.ge.s32.totalorder %s36_s20, 2  ;;  %p1310_p1 = scmp.ge.s32.totalorder %s1578_s19, 1 }
   0x5   : > { %p252_p2 = scmp.lt.s32.totalorder %s1578_s19, 13 }
   0x6   : > { %s1961_s20 = smov (%p38_p0, %s36_s20), 0  ;;  %s1963_s21 = smov (!%p38_p0, %s40_s21), %s1574_s18 }
   0x7   : > { %p253_p3 = pnand %p1310_p1, %p252_p2  ;;  %p42_p4 = scmp.ge.s32.totalorder %s1963_s21, 6 }
   0x8   : > { %s1311_s22 = sshll.u32 (!%p253_p3), %s1562_s15, 5  ;;  %p317_p5 = scmp.lt.s32.totalorder (!%p253_p3), %s1566_s16, 5 }
   0x9   : > { %s1965_s21 = smov (%p42_p4, %s1963_s21), 0  ;;  %256 = sbr.rel (%p253_p3) target bundleno = 282 (0x11a), region = 36 }
   0xa   : > { %p1642_p6 = scmp.lt.s32.totalorder (!%p253_p3), %s1311_s22, 63 }
   0xe   : > { %vm613_vm0 = vcmask 1044480   ;;  %vm372_vm1 = vcmask 64512   ;;  %s1967_s16 = smov (!%p317_p5, %s1566_s16), 5  ;;  %v1580_v0 = vmov 0.0   ;;  %s1969_s22 = smov (!%p1642_p6, %s1311_s22), 63  ;;  %vm614_vm2 = vcmask 1045504  }
   0xf   : > { %375 = vst.msk [vmem:[#allocation2 + $0x10] sm:$0xff] %vm372_vm1, %v1580_v0  ;;  %373 = vst.msk [vmem:[#allocation2] sm:$0xff] %vm372_vm1, %v1580_v0  ;;  %v1581_v1 = vmov 65535   ;;  %s1312_s24 = sshll.u32 %s1967_s16, 6  ;;  %s1389_s25 = sshll.u32 %s1967_s16, 4  ;;  %vm564_vm3 = vcmask 220160  }
  0x10   : > { %374 = vst.msk [vmem:[#allocation2 + $0x8] sm:$0xff] %vm372_vm1, %v1580_v0  ;;  %376 = vst.msk [vmem:[#allocation2 + $0x18] sm:$0xff] %vm372_vm1, %v1580_v0  ;;  %v615_v2 = vsel %vm613_vm0, 4294967295, %v1581_v1  ;;  %s1687_s26 = sadd.s32 %s1312_s24, %s1969_s22  ;;  %s340_s29 = scalar_lea.vmem %s1951_s1, %s1389_s25  ;;  %vm1119_vm4 = vcmask 60416  }
  0x11   : > { %377 = vst.msk [vmem:[#allocation2 + $0x20] sm:$0xff] %vm372_vm1, %v1580_v0  ;;  %378 = vst.msk [vmem:[#allocation2 + $0x28] sm:$0xff] %vm372_vm1, %v1580_v0  ;;  %s1313_s30 = sshll.u32 %s1687_s26, 2  ;;  %v616_v3 = vsel %vm614_vm2, %v615_v2, 0  ;;  %v1522_v4 = vld [vmem:[%s340_s29 + $0x8] sm:$0x3f]   ;;  %s347_s10 = scalar_lea.vmem %s1952_s2, %s1967_s16 }
  0x12   : > { %379 = vst.msk [vmem:[#allocation2 + $0x30] sm:$0xff] %vm372_vm1, %v1580_v0  ;;  %380 = vst.msk [vmem:[#allocation2 + $0x38] sm:$0xff] %vm372_vm1, %v1580_v0  ;;  %s1698_s7 = scalar_lea.vmem %s1950_s0, %s1313_s30  ;;  %v1523_v5 = vld [vmem:[%s340_s29] sm:$0xff]   ;;  %v618_v6 = vand.u32 %v1522_v4, %v616_v3  ;;  %s353_s13 = scalar_lea.vmem %s1953_s3, %s1967_s16 }
  0x13   : > { %381 = vst.msk [vmem:[#allocation2 + $0x40] sm:$0xff] %vm372_vm1, %v1580_v0  ;;  %382 = vst.msk [vmem:[#allocation2 + $0x48] sm:$0xff] %vm372_vm1, %v1580_v0  ;;  %v1524_v7 = vld [vmem:[%s1698_s7] sm:$0xff]   ;;  %v1526_v9 = vld [vmem:[%s1698_s7 + $0x8] sm:$0xff]   ;;  %s1769_s16 = scalar_lea.vmem %s1954_s4, %s1313_s30 }
  0x14   : > { %383 = vst.msk [vmem:[#allocation2 + $0x50] sm:$0xff] %vm372_vm1, %v1580_v0  ;;  %384 = vst.msk [vmem:[#allocation2 + $0x58] sm:$0xff] %vm372_vm1, %v1580_v0  ;;  %v1525_v8 = vld [vmem:[%s1698_s7 + $0x40] sm:$0xff]   ;;  %1440 = vmatprep.subr.bf16.mxu0 %v618_v6  ;;  %1476 = vmatprep.subr.bf16.mxu1 %v618_v6  ;;  %v1527_v10 = vld [vmem:[%s1698_s7 + $0x48] sm:$0xff]  }
  0x15   : > { %385 = vst.msk [vmem:[#allocation2 + $0x60] sm:$0xff] %vm372_vm1, %v1580_v0  ;;  %386 = vst.msk [vmem:[#allocation2 + $0x68] sm:$0xff] %vm372_vm1, %v1580_v0  ;;  %1441 = vmatpush3.bf16.msra.mxu0 %v618_v6  ;;  %1478 = vmatpush3.bf16.msra.mxu1 %v618_v6  ;;  %v1528_v11 = vld [vmem:[%s1698_s7 + $0x10] sm:$0xff]   ;;  %v1530_v13 = vld [vmem:[%s1698_s7 + $0x18] sm:$0xff]  }
  0x16   : > { %387 = vst.msk [vmem:[#allocation2 + $0x70] sm:$0xff] %vm372_vm1, %v1580_v0  ;;  %388 = vst.msk [vmem:[#allocation2 + $0x78] sm:$0xff] %vm372_vm1, %v1580_v0  ;;  %1442 = vmatprep.subr.bf16.mxu0 %v1523_v5  ;;  %1477 = vmatprep.subr.bf16.mxu1 %v1523_v5  ;;  %v1529_v12 = vld [vmem:[%s1698_s7 + $0x50] sm:$0xff]   ;;  %v1531_v14 = vld [vmem:[%s1698_s7 + $0x58] sm:$0xff]  }
  0x17   : > { %389 = vst.msk [vmem:[#allocation2 + $0x80] sm:$0xff] %vm372_vm1, %v1580_v0  ;;  %390 = vst.msk [vmem:[#allocation2 + $0x88] sm:$0xff] %vm372_vm1, %v1580_v0  ;;  %1444 = vmatprep.mubr.msk.bf16.mxu0 %vm564_vm3, %v1524_v7  ;;  %1460 = vmatprep.mubr.msk.bf16.mxu1 %vm564_vm3, %v1525_v8  ;;  %v1532_v15 = vld [vmem:[%s1698_s7 + $0x20] sm:$0xff]   ;;  %v1534_v17 = vld [vmem:[%s1698_s7 + $0x28] sm:$0xff]  }
  0x18   : > { %391 = vst.msk [vmem:[#allocation2 + $0x90] sm:$0xff] %vm372_vm1, %v1580_v0  ;;  %392 = vst.msk [vmem:[#allocation2 + $0x98] sm:$0xff] %vm372_vm1, %v1580_v0  ;;  %v1533_v16 = vld [vmem:[%s1698_s7 + $0x60] sm:$0xff]   ;;  %v1535_v18 = vld [vmem:[%s1698_s7 + $0x68] sm:$0xff]  }
  0x19   : > { %393 = vst.msk [vmem:[#allocation2 + $0xa0] sm:$0xff] %vm372_vm1, %v1580_v0  ;;  %394 = vst.msk [vmem:[#allocation2 + $0xa8] sm:$0xff] %vm372_vm1, %v1580_v0  ;;  %1443 = vmatpush3.bf16.msra.mxu0 %v1523_v5  ;;  %1479 = vmatpush3.bf16.msra.mxu1 %v1523_v5  ;;  %v1536_v19 = vld [vmem:[%s1698_s7 + $0x30] sm:$0xff]   ;;  %v1538_v21 = vld [vmem:[%s1698_s7 + $0x38] sm:$0xff]  }
  0x1a   : > { %395 = vst.msk [vmem:[#allocation2 + $0xb0] sm:$0xff] %vm372_vm1, %v1580_v0  ;;  %396 = vst.msk [vmem:[#allocation2 + $0xb8] sm:$0xff] %vm372_vm1, %v1580_v0  ;;  %v1537_v20 = vld [vmem:[%s1698_s7 + $0x70] sm:$0xff]   ;;  %v1539_v22 = vld [vmem:[%s1698_s7 + $0x78] sm:$0xff]  }
  0x1b   : > { %397 = vst.msk [vmem:[#allocation2 + $0xc0] sm:$0xff] %vm372_vm1, %v1580_v0  ;;  %398 = vst.msk [vmem:[#allocation2 + $0xc8] sm:$0xff] %vm372_vm1, %v1580_v0  ;;  %v407_v23 = vld [vmem:[#allocation2 + $0x10] sm:$0xff]  ;;  %v405_v27 = vld [vmem:[#allocation2] sm:$0xff] }
  0x1c   : > { %399 = vst.msk [vmem:[#allocation2 + $0xd0] sm:$0xff] %vm372_vm1, %v1580_v0  ;;  %400 = vst.msk [vmem:[#allocation2 + $0xd8] sm:$0xff] %vm372_vm1, %v1580_v0  ;;  %1445 = vmatmul.mubr.msk.bf16.vlgmr.msra.gmra.mxu0 %vm564_vm3, %v1526_v9  ;;  %1461 = vmatmul.mubr.msk.bf16.vlgmr.msra.gmra.mxu1 %vm564_vm3, %v1527_v10  ;;  %v408_v33 = vld [vmem:[#allocation2 + $0x18] sm:$0xff]  ;;  %v406_v39 = vld [vmem:[#allocation2 + $0x8] sm:$0xff] }
  0x1d   : > { %401 = vst.msk [vmem:[#allocation2 + $0xe0] sm:$0xff] %vm372_vm1, %v1580_v0  ;;  %402 = vst.msk [vmem:[#allocation2 + $0xe8] sm:$0xff] %vm372_vm1, %v1580_v0  ;;  %1448 = vmatprep.mubr.msk.bf16.mxu0 %vm564_vm3, %v1528_v11  ;;  %1464 = vmatprep.mubr.msk.bf16.mxu1 %vm564_vm3, %v1529_v12  ;;  %v411_v45 = vld [vmem:[#allocation2 + $0x30] sm:$0xff]  ;;  %v1746_v49 = vld [vmem:[%s347_s10] ss:$0 sm:$0xff] }
  0x1e   : > { %403 = vst.msk [vmem:[#allocation2 + $0xf0] sm:$0xff] %vm372_vm1, %v1580_v0  ;;  %404 = vst.msk [vmem:[#allocation2 + $0xf8] sm:$0xff] %vm372_vm1, %v1580_v0  ;;  %v421_v28 = vld [vmem:[#allocation2 + $0x80] sm:$0xff]  ;;  %v422_v40 = vld [vmem:[#allocation2 + $0x88] sm:$0xff] }
  0x1f   : > { %v423_v24 = vld [vmem:[#allocation2 + $0x90] sm:$0xff]  ;;  %v424_v34 = vld [vmem:[#allocation2 + $0x98] sm:$0xff]  ;;  %v409_v52 = vld [vmem:[#allocation2 + $0x20] sm:$0xff] }
  0x20   : > { %v425_v53 = vld [vmem:[#allocation2 + $0xa0] sm:$0xff]  ;;  %v412_v1 = vld [vmem:[#allocation2 + $0x38] sm:$0xff]  ;;  %v410_v11 = vld [vmem:[#allocation2 + $0x28] sm:$0xff] }
  0x21   : > { %v427_v46 = vld [vmem:[#allocation2 + $0xb0] sm:$0xff]  ;;  %v1750_v56 = vld [vmem:[%s353_s13] ss:$0 sm:$0xff]  ;;  %v428_v2 = vld [vmem:[#allocation2 + $0xb8] sm:$0xff] }
  0x22   : > { %v426_v12 = vld [vmem:[#allocation2 + $0xa8] sm:$0xff] }
  0x24   : > { %1449 = vmatmul.mubr.msk.bf16.gmra.mxu0 %vm564_vm3, %v1530_v13  ;;  %1465 = vmatmul.mubr.msk.bf16.gmra.mxu1 %vm564_vm3, %v1531_v14 }
  0x25   : > { %1452 = vmatprep.mubr.msk.bf16.mxu0 %vm564_vm3, %v1532_v15  ;;  %1468 = vmatprep.mubr.msk.bf16.mxu1 %vm564_vm3, %v1533_v16 }
  0x2c   : > { %1453 = vmatmul.mubr.msk.bf16.gmra.mxu0 %vm564_vm3, %v1534_v17  ;;  %1469 = vmatmul.mubr.msk.bf16.gmra.mxu1 %vm564_vm3, %v1535_v18 }
  0x2d   : > { %1456 = vmatprep.mubr.msk.bf16.mxu0 %vm564_vm3, %v1536_v19  ;;  %1472 = vmatprep.mubr.msk.bf16.mxu1 %vm564_vm3, %v1537_v20 }
  0x34   : > { %1457 = vmatmul.mubr.msk.bf16.gmra.mxu0 %vm564_vm3, %v1538_v21  ;;  %1473 = vmatmul.mubr.msk.bf16.gmra.mxu1 %vm564_vm3, %v1539_v22 }
  0xdc   : > { %v1446_v25 = vpop.f32.mrf.mxu0  ;;  %v1462_v26 = vpop.f32.mrf.mxu1 }
  0xdd   : > { %v783_v29 = vadd.f32 %v1446_v25, %v407_v23  ;;  %v799_v30 = vadd.f32 %v1462_v26, %v423_v24 }
  0xde   : > { %v654_v31 = vpop.f32.mrf.mxu0  ;;  %v718_v32 = vpop.f32.mrf.mxu1 }
  0xdf   : > { %816 = vst.msk [vmem:[#allocation2 + $0x10] sm:$0xff] %vm372_vm1, %v783_v29  ;;  %832 = vst.msk [vmem:[#allocation2 + $0x90] sm:$0xff] %vm372_vm1, %v799_v30  ;;  %v781_v35 = vadd.f32 %v654_v31, %v405_v27  ;;  %v797_v36 = vadd.f32 %v718_v32, %v421_v28 }
  0xe0   : > { %v1447_v37 = vpop.f32.mrf.mxu0  ;;  %v1463_v38 = vpop.f32.mrf.mxu1 }
  0xe1   : > { %814 = vst.msk [vmem:[#allocation2] sm:$0xff] %vm372_vm1, %v781_v35  ;;  %830 = vst.msk [vmem:[#allocation2 + $0x80] sm:$0xff] %vm372_vm1, %v797_v36  ;;  %v784_v41 = vadd.f32 %v1447_v37, %v408_v33  ;;  %v800_v42 = vadd.f32 %v1463_v38, %v424_v34 }
  0xe2   : > { %v657_v43 = vpop.f32.mrf.mxu0  ;;  %v721_v44 = vpop.f32.mrf.mxu1 }
  0xe3   : > { %817 = vst.msk [vmem:[#allocation2 + $0x18] sm:$0xff] %vm372_vm1, %v784_v41  ;;  %833 = vst.msk [vmem:[#allocation2 + $0x98] sm:$0xff] %vm372_vm1, %v800_v42  ;;  %v782_v47 = vadd.f32 %v657_v43, %v406_v39  ;;  %v798_v48 = vadd.f32 %v721_v44, %v422_v40 }
  0xe4   : > { %v1450_v50 = vpop.f32.mrf.mxu0  ;;  %v1466_v51 = vpop.f32.mrf.mxu1 }
  0xe5   : > { %815 = vst.msk [vmem:[#allocation2 + $0x8] sm:$0xff] %vm372_vm1, %v782_v47  ;;  %831 = vst.msk [vmem:[#allocation2 + $0x88] sm:$0xff] %vm372_vm1, %v798_v48  ;;  %v787_v54 = vadd.f32 %v1450_v50, %v411_v45  ;;  %v803_v55 = vadd.f32 %v1466_v51, %v427_v46 }
  0xe6   : > { %v851_v57 = vld [vmem:[#allocation2 + $0x10] sm:$0xff]  ;;  %v670_v59 = vpop.f32.mrf.mxu0  ;;  %v734_v60 = vpop.f32.mrf.mxu1 }
  0xe7   : > { %v867_v58 = vld [vmem:[#allocation2 + $0x90] sm:$0xff]  ;;  %v890_v61 = vmul.f32 %v1746_v49, %v851_v57  ;;  %820 = vst.msk [vmem:[#allocation2 + $0x30] sm:$0xff] %vm372_vm1, %v787_v54  ;;  %836 = vst.msk [vmem:[#allocation2 + $0xb0] sm:$0xff] %vm372_vm1, %v803_v55  ;;  %v785_v63 = vadd.f32 %v670_v59, %v409_v52  ;;  %v801_v0 = vadd.f32 %v734_v60, %v425_v53 }
  0xe8   : > { %v906_v62 = vmul.f32 %v1746_v49, %v867_v58  ;;  %v849_v3 = vld [vmem:[#allocation2] sm:$0xff]  ;;  %v1451_v5 = vpop.f32.mrf.mxu0  ;;  %v1467_v6 = vpop.f32.mrf.mxu1 }
  0xe9   : > { %v865_v4 = vld [vmem:[#allocation2 + $0x80] sm:$0xff]  ;;  %v929_v7 = vadd.f32 %v1750_v56, %v890_v61  ;;  %v888_v9 = vmul.f32 %v1746_v49, %v849_v3  ;;  %818 = vst.msk [vmem:[#allocation2 + $0x20] sm:$0xff] %vm372_vm1, %v785_v63  ;;  %834 = vst.msk [vmem:[#allocation2 + $0xa0] sm:$0xff] %vm372_vm1, %v801_v0  ;;  %v788_v15 = vadd.f32 %v1451_v5, %v412_v1 }
  0xea   : > { %v945_v8 = vadd.f32 %v1750_v56, %v906_v62  ;;  %v904_v10 = vmul.f32 %v1746_v49, %v865_v4  ;;  %v852_v13 = vld [vmem:[#allocation2 + $0x18] sm:$0xff]  ;;  %v804_v16 = vadd.f32 %v1467_v6, %v428_v2  ;;  %v673_v17 = vpop.f32.mrf.mxu0  ;;  %v737_v18 = vpop.f32.mrf.mxu1 }
  0xeb   : > { %v868_v14 = vld [vmem:[#allocation2 + $0x98] sm:$0xff]  ;;  %v961_v19 = vmax.f32 %v929_v7, 0.0  ;;  %v927_v21 = vadd.f32 %v1750_v56, %v888_v9  ;;  %v891_v23 = vmul.f32 %v1746_v49, %v852_v13  ;;  %821 = vst.msk [vmem:[#allocation2 + $0x38] sm:$0xff] %vm372_vm1, %v788_v15  ;;  %v786_v27 = vadd.f32 %v673_v17, %v410_v11  ;;  %v415_v13 = vld [vmem:[#allocation2 + $0x50] sm:$0xff] }
  0xec   : > { %v977_v20 = vmax.f32 %v945_v8, 0.0  ;;  %v943_v22 = vadd.f32 %v1750_v56, %v904_v10  ;;  %v907_v24 = vmul.f32 %v1746_v49, %v868_v14  ;;  %v850_v25 = vld [vmem:[#allocation2 + $0x8] sm:$0xff]  ;;  %837 = vst.msk [vmem:[#allocation2 + $0xb8] sm:$0xff] %vm372_vm1, %v804_v16  ;;  %v802_v28 = vadd.f32 %v737_v18, %v426_v12  ;;  %v1775_v29 = vpop.f32.mrf.mxu0  ;;  %v1777_v30 = vpop.f32.mrf.mxu1  ;;  %v431_v14 = vld [vmem:[#allocation2 + $0xd0] sm:$0xff] }
  0xed   : > { %v866_v26 = vld [vmem:[#allocation2 + $0x88] sm:$0xff]  ;;  %v1392_v31 = vpack.c.bf16 %v961_v19, %v961_v19  ;;  %v959_v33 = vmax.f32 %v927_v21, 0.0  ;;  %v930_v35 = vadd.f32 %v1750_v56, %v891_v23  ;;  %v889_v37 = vmul.f32 %v1746_v49, %v850_v25  ;;  %819 = vst.msk [vmem:[#allocation2 + $0x28] sm:$0xff] %vm372_vm1, %v786_v27  ;;  %v413_v23 = vld [vmem:[#allocation2 + $0x40] sm:$0xff] }
  0xee   : > { %v1408_v32 = vpack.c.bf16 %v977_v20, %v977_v20  ;;  %v975_v34 = vmax.f32 %v943_v22, 0.0  ;;  %v946_v36 = vadd.f32 %v1750_v56, %v907_v24  ;;  %v905_v38 = vmul.f32 %v1746_v49, %v866_v26  ;;  %v855_v39 = vld [vmem:[#allocation2 + $0x30] sm:$0xff]  ;;  %835 = vst.msk [vmem:[#allocation2 + $0xa8] sm:$0xff] %vm372_vm1, %v802_v28  ;;  %v1785_v41 = vpop.f32.mrf.mxu0  ;;  %v1787_v42 = vpop.f32.mrf.mxu1  ;;  %v429_v28 = vld [vmem:[#allocation2 + $0xc0] sm:$0xff] }
  0xef   : > { %v871_v40 = vld [vmem:[#allocation2 + $0xb0] sm:$0xff]  ;;  %1122 = vst.msk [vmem:[%s1769_s16 + $0x8] sm:$0xf] %vm1119_vm4, %v1392_v31  ;;  %v1390_v43 = vpack.c.bf16 %v959_v33, %v959_v33  ;;  %v894_v45 = vmul.f32 %v1746_v49, %v855_v39  ;;  %v962_v47 = vmax.f32 %v930_v35, 0.0  ;;  %v928_v50 = vadd.f32 %v1750_v56, %v889_v37  ;;  %v416_v31 = vld [vmem:[#allocation2 + $0x58] sm:$0xff]  ;;  %v414_v39 = vld [vmem:[#allocation2 + $0x48] sm:$0xff] }
  0xf0   : > { %1138 = vst.msk [vmem:[%s1769_s16 + $0x48] sm:$0xf] %vm1119_vm4, %v1408_v32  ;;  %v1406_v44 = vpack.c.bf16 %v975_v34, %v975_v34  ;;  %v910_v46 = vmul.f32 %v1746_v49, %v871_v40  ;;  %v978_v48 = vmax.f32 %v946_v36, 0.0  ;;  %v944_v51 = vadd.f32 %v1750_v56, %v905_v38  ;;  %v853_v52 = vld [vmem:[#allocation2 + $0x20] sm:$0xff]  ;;  %v1797_v54 = vpop.f32.mrf.mxu0  ;;  %v1799_v55 = vpop.f32.mrf.mxu1  ;;  %v432_v32 = vld [vmem:[#allocation2 + $0xd8] sm:$0xff] }
  0xf1   : > { %v869_v53 = vld [vmem:[#allocation2 + $0xa0] sm:$0xff]  ;;  %1120 = vst.msk [vmem:[%s1769_s16] sm:$0xf] %vm1119_vm4, %v1390_v43  ;;  %v933_v57 = vadd.f32 %v1750_v56, %v894_v45  ;;  %v892_v59 = vmul.f32 %v1746_v49, %v853_v52  ;;  %v1393_v61 = vpack.c.bf16 %v962_v47, %v962_v47  ;;  %v960_v63 = vmax.f32 %v928_v50, 0.0  ;;  %v419_v47 = vld [vmem:[#allocation2 + $0x70] sm:$0xff] }
  0xf2   : > { %1136 = vst.msk [vmem:[%s1769_s16 + $0x40] sm:$0xf] %vm1119_vm4, %v1406_v44  ;;  %v949_v58 = vadd.f32 %v1750_v56, %v910_v46  ;;  %v908_v60 = vmul.f32 %v1746_v49, %v869_v53  ;;  %v1409_v62 = vpack.c.bf16 %v978_v48, %v978_v48  ;;  %v976_v0 = vmax.f32 %v944_v51, 0.0  ;;  %v1809_v1 = vpop.f32.mrf.mxu0  ;;  %v1811_v2 = vpop.f32.mrf.mxu1  ;;  %v856_v7 = vld [vmem:[#allocation2 + $0x38] sm:$0xff]  ;;  %v430_v46 = vld [vmem:[#allocation2 + $0xc8] sm:$0xff]  ;;  %v435_v48 = vld [vmem:[#allocation2 + $0xf0] sm:$0xff] }
  0xf3   : > { %v965_v3 = vmax.f32 %v933_v57, 0.0  ;;  %v931_v5 = vadd.f32 %v1750_v56, %v892_v59  ;;  %v872_v8 = vld [vmem:[#allocation2 + $0xb8] sm:$0xff]  ;;  %1123 = vst.msk [vmem:[%s1769_s16 + $0xc] sm:$0xf] %vm1119_vm4, %v1393_v61  ;;  %v1391_v9 = vpack.c.bf16 %v960_v63, %v960_v63  ;;  %v895_v11 = vmul.f32 %v1746_v49, %v856_v7  ;;  %v417_v57 = vld [vmem:[#allocation2 + $0x60] sm:$0xff] }
  0xf4   : > { %v981_v4 = vmax.f32 %v949_v58, 0.0  ;;  %v947_v6 = vadd.f32 %v1750_v56, %v908_v60  ;;  %1139 = vst.msk [vmem:[%s1769_s16 + $0x4c] sm:$0xf] %vm1119_vm4, %v1409_v62  ;;  %v1407_v10 = vpack.c.bf16 %v976_v0, %v976_v0  ;;  %v911_v12 = vmul.f32 %v1746_v49, %v872_v8  ;;  %v1458_v15 = vpop.f32.mrf.mxu0  ;;  %v1474_v16 = vpop.f32.mrf.mxu1  ;;  %v854_v21 = vld [vmem:[#allocation2 + $0x28] sm:$0xff]  ;;  %v433_v58 = vld [vmem:[#allocation2 + $0xe0] sm:$0xff]  ;;  %v420_v59 = vld [vmem:[#allocation2 + $0x78] sm:$0xff] }
  0xf5   : > { %v1396_v17 = vpack.c.bf16 %v965_v3, %v965_v3  ;;  %v963_v19 = vmax.f32 %v931_v5, 0.0  ;;  %v870_v22 = vld [vmem:[#allocation2 + $0xa8] sm:$0xff]  ;;  %1121 = vst.msk [vmem:[%s1769_s16 + $0x4] sm:$0xf] %vm1119_vm4, %v1391_v9  ;;  %v934_v24 = vadd.f32 %v1750_v56, %v895_v11  ;;  %v893_v26 = vmul.f32 %v1746_v49, %v854_v21  ;;  %v436_v0 = vld [vmem:[#allocation2 + $0xf8] sm:$0xff] }
  0xf6   : > { %v1412_v18 = vpack.c.bf16 %v981_v4, %v981_v4  ;;  %v979_v20 = vmax.f32 %v947_v6, 0.0  ;;  %1137 = vst.msk [vmem:[%s1769_s16 + $0x44] sm:$0xf] %vm1119_vm4, %v1407_v10  ;;  %v950_v25 = vadd.f32 %v1750_v56, %v911_v12  ;;  %v909_v27 = vmul.f32 %v1746_v49, %v870_v22  ;;  %v702_v33 = vpop.f32.mrf.mxu0  ;;  %v766_v34 = vpop.f32.mrf.mxu1  ;;  %v418_v3 = vld [vmem:[#allocation2 + $0x68] sm:$0xff] }
  0xf7   : > { %1126 = vst.msk [vmem:[%s1769_s16 + $0x18] sm:$0xf] %vm1119_vm4, %v1396_v17  ;;  %v1394_v35 = vpack.c.bf16 %v963_v19, %v963_v19  ;;  %v791_v37 = vadd.f32 %v1775_v29, %v415_v13  ;;  %v807_v38 = vadd.f32 %v1777_v30, %v431_v14  ;;  %v966_v40 = vmax.f32 %v934_v24, 0.0  ;;  %v434_v5 = vld [vmem:[#allocation2 + $0xe8] sm:$0xff] }
  0xf8   : > { %1142 = vst.msk [vmem:[%s1769_s16 + $0x58] sm:$0xf] %vm1119_vm4, %v1412_v18  ;;  %v1410_v36 = vpack.c.bf16 %v979_v20, %v979_v20  ;;  %v982_v43 = vmax.f32 %v950_v25, 0.0  ;;  %v932_v44 = vadd.f32 %v1750_v56, %v893_v26  ;;  %v948_v45 = vadd.f32 %v1750_v56, %v909_v27  ;;  %v1459_v50 = vpop.f32.mrf.mxu0  ;;  %v1475_v51 = vpop.f32.mrf.mxu1 }
  0xf9   : > { %1124 = vst.msk [vmem:[%s1769_s16 + $0x10] sm:$0xf] %vm1119_vm4, %v1394_v35  ;;  %v789_v29 = vadd.f32 %v1785_v41, %v413_v23  ;;  %v805_v30 = vadd.f32 %v1787_v42, %v429_v28  ;;  %v792_v52 = vadd.f32 %v1797_v54, %v416_v31  ;;  %v808_v53 = vadd.f32 %v1799_v55, %v432_v32 }
  0xfa   : > { %1140 = vst.msk [vmem:[%s1769_s16 + $0x50] sm:$0xf] %vm1119_vm4, %v1410_v36  ;;  %v1397_v60 = vpack.c.bf16 %v966_v40, %v966_v40  ;;  %v1413_v61 = vpack.c.bf16 %v982_v43, %v982_v43  ;;  %v964_v62 = vmax.f32 %v932_v44, 0.0  ;;  %v980_v63 = vmax.f32 %v948_v45, 0.0  ;;  %v705_v4 = vpop.f32.mrf.mxu0  ;;  %v769_v41 = vpop.f32.mrf.mxu1 }
  0xfb   : > { %824 = vst.msk [vmem:[#allocation2 + $0x50] sm:$0xff] %vm372_vm1, %v791_v37  ;;  %840 = vst.msk [vmem:[#allocation2 + $0xd0] sm:$0xff] %vm372_vm1, %v807_v38  ;;  %v790_v42 = vadd.f32 %v1809_v1, %v414_v39  ;;  %v806_v54 = vadd.f32 %v1811_v2, %v430_v46  ;;  %v795_v55 = vadd.f32 %v1458_v15, %v419_v47 }
  0xfc   : > { %822 = vst.msk [vmem:[#allocation2 + $0x40] sm:$0xff] %vm372_vm1, %v789_v29  ;;  %838 = vst.msk [vmem:[#allocation2 + $0xc0] sm:$0xff] %vm372_vm1, %v805_v30  ;;  %v811_v6 = vadd.f32 %v1474_v16, %v435_v48  ;;  %v1395_v7 = vpack.c.bf16 %v964_v62, %v964_v62  ;;  %v1411_v8 = vpack.c.bf16 %v980_v63, %v980_v63 }
  0xfd   : > { %825 = vst.msk [vmem:[#allocation2 + $0x58] sm:$0xff] %vm372_vm1, %v792_v52  ;;  %841 = vst.msk [vmem:[#allocation2 + $0xd8] sm:$0xff] %vm372_vm1, %v808_v53  ;;  %v793_v9 = vadd.f32 %v702_v33, %v417_v57  ;;  %v809_v10 = vadd.f32 %v766_v34, %v433_v58  ;;  %v796_v1 = vadd.f32 %v1459_v50, %v420_v59 }
  0xfe   : > { %1127 = vst.msk [vmem:[%s1769_s16 + $0x1c] sm:$0xf] %vm1119_vm4, %v1397_v60  ;;  %1143 = vst.msk [vmem:[%s1769_s16 + $0x5c] sm:$0xf] %vm1119_vm4, %v1413_v61  ;;  %v812_v2 = vadd.f32 %v1475_v51, %v436_v0  ;;  %v794_v11 = vadd.f32 %v705_v4, %v418_v3  ;;  %v810_v12 = vadd.f32 %v769_v41, %v434_v5 }
  0xff   : > { %823 = vst.msk [vmem:[#allocation2 + $0x48] sm:$0xff] %vm372_vm1, %v790_v42  ;;  %839 = vst.msk [vmem:[#allocation2 + $0xc8] sm:$0xff] %vm372_vm1, %v806_v54 }
 0x100   : > { %828 = vst.msk [vmem:[#allocation2 + $0x70] sm:$0xff] %vm372_vm1, %v795_v55  ;;  %844 = vst.msk [vmem:[#allocation2 + $0xf0] sm:$0xff] %vm372_vm1, %v811_v6 }
 0x101   : > { %1125 = vst.msk [vmem:[%s1769_s16 + $0x14] sm:$0xf] %vm1119_vm4, %v1395_v7  ;;  %1141 = vst.msk [vmem:[%s1769_s16 + $0x54] sm:$0xf] %vm1119_vm4, %v1411_v8 }
 0x102   : > { %826 = vst.msk [vmem:[#allocation2 + $0x60] sm:$0xff] %vm372_vm1, %v793_v9  ;;  %842 = vst.msk [vmem:[#allocation2 + $0xe0] sm:$0xff] %vm372_vm1, %v809_v10  ;;  %v859_v13 = vld [vmem:[#allocation2 + $0x50] sm:$0xff] }
 0x103   : > { %829 = vst.msk [vmem:[#allocation2 + $0x78] sm:$0xff] %vm372_vm1, %v796_v1  ;;  %845 = vst.msk [vmem:[#allocation2 + $0xf8] sm:$0xff] %vm372_vm1, %v812_v2  ;;  %v875_v14 = vld [vmem:[#allocation2 + $0xd0] sm:$0xff]  ;;  %v898_v15 = vmul.f32 %v1746_v49, %v859_v13  ;;  %v857_v17 = vld [vmem:[#allocation2 + $0x40] sm:$0xff] }
 0x104   : > { %827 = vst.msk [vmem:[#allocation2 + $0x68] sm:$0xff] %vm372_vm1, %v794_v11  ;;  %843 = vst.msk [vmem:[#allocation2 + $0xe8] sm:$0xff] %vm372_vm1, %v810_v12  ;;  %v914_v16 = vmul.f32 %v1746_v49, %v875_v14  ;;  %v873_v18 = vld [vmem:[#allocation2 + $0xc0] sm:$0xff]  ;;  %v860_v19 = vld [vmem:[#allocation2 + $0x58] sm:$0xff]  ;;  %v896_v22 = vmul.f32 %v1746_v49, %v857_v17 }
 0x105   : > { %v937_v20 = vadd.f32 %v1750_v56, %v898_v15  ;;  %v912_v23 = vmul.f32 %v1746_v49, %v873_v18  ;;  %v876_v24 = vld [vmem:[#allocation2 + $0xd8] sm:$0xff]  ;;  %v899_v25 = vmul.f32 %v1746_v49, %v860_v19 }
 0x106   : > { %v953_v21 = vadd.f32 %v1750_v56, %v914_v16  ;;  %v915_v26 = vmul.f32 %v1746_v49, %v876_v24  ;;  %v858_v27 = vld [vmem:[#allocation2 + $0x48] sm:$0xff]  ;;  %v935_v33 = vadd.f32 %v1750_v56, %v896_v22 }
 0x107   : > { %v874_v28 = vld [vmem:[#allocation2 + $0xc8] sm:$0xff]  ;;  %v969_v31 = vmax.f32 %v937_v20, 0.0  ;;  %v951_v34 = vadd.f32 %v1750_v56, %v912_v23  ;;  %v938_v35 = vadd.f32 %v1750_v56, %v899_v25  ;;  %v897_v37 = vmul.f32 %v1746_v49, %v858_v27  ;;  %v863_v39 = vld [vmem:[#allocation2 + $0x70] sm:$0xff] }
 0x108   : > { %v985_v32 = vmax.f32 %v953_v21, 0.0  ;;  %v954_v36 = vadd.f32 %v1750_v56, %v915_v26  ;;  %v913_v38 = vmul.f32 %v1746_v49, %v874_v28  ;;  %v879_v40 = vld [vmem:[#allocation2 + $0xf0] sm:$0xff]  ;;  %v967_v45 = vmax.f32 %v935_v33, 0.0 }
 0x109   : > { %v1400_v43 = vpack.c.bf16 %v969_v31, %v969_v31  ;;  %v983_v46 = vmax.f32 %v951_v34, 0.0  ;;  %v970_v47 = vmax.f32 %v938_v35, 0.0  ;;  %v936_v50 = vadd.f32 %v1750_v56, %v897_v37  ;;  %v861_v29 = vld [vmem:[#allocation2 + $0x60] sm:$0xff] }
 0x10a   : > { %v1416_v44 = vpack.c.bf16 %v985_v32, %v985_v32  ;;  %v986_v48 = vmax.f32 %v954_v36, 0.0  ;;  %v952_v51 = vadd.f32 %v1750_v56, %v913_v38  ;;  %v877_v30 = vld [vmem:[#allocation2 + $0xe0] sm:$0xff]  ;;  %v1398_v52 = vpack.c.bf16 %v967_v45, %v967_v45  ;;  %v864_v59 = vld [vmem:[#allocation2 + $0x78] sm:$0xff] }
 0x10b   : > { %1130 = vst.msk [vmem:[%s1769_s16 + $0x28] sm:$0xf] %vm1119_vm4, %v1400_v43  ;;  %v1414_v53 = vpack.c.bf16 %v983_v46, %v983_v46  ;;  %v902_v57 = vmul.f32 %v1746_v49, %v863_v39  ;;  %v918_v58 = vmul.f32 %v1746_v49, %v879_v40  ;;  %v880_v60 = vld [vmem:[#allocation2 + $0xf8] sm:$0xff]  ;;  %v1401_v61 = vpack.c.bf16 %v970_v47, %v970_v47  ;;  %v862_v42 = vld [vmem:[#allocation2 + $0x68] sm:$0xff] }
 0x10c   : > { %1146 = vst.msk [vmem:[%s1769_s16 + $0x68] sm:$0xf] %vm1119_vm4, %v1416_v44  ;;  %v1417_v62 = vpack.c.bf16 %v986_v48, %v986_v48  ;;  %v968_v63 = vmax.f32 %v936_v50, 0.0  ;;  %v984_v0 = vmax.f32 %v952_v51, 0.0  ;;  %1128 = vst.msk [vmem:[%s1769_s16 + $0x20] sm:$0xf] %vm1119_vm4, %v1398_v52  ;;  %v900_v5 = vmul.f32 %v1746_v49, %v861_v29 }
 0x10d   : > { %1144 = vst.msk [vmem:[%s1769_s16 + $0x60] sm:$0xf] %vm1119_vm4, %v1414_v53  ;;  %v941_v3 = vadd.f32 %v1750_v56, %v902_v57  ;;  %v957_v4 = vadd.f32 %v1750_v56, %v918_v58  ;;  %v916_v41 = vmul.f32 %v1746_v49, %v877_v30  ;;  %v878_v54 = vld [vmem:[#allocation2 + $0xe8] sm:$0xff]  ;;  %1131 = vst.msk [vmem:[%s1769_s16 + $0x2c] sm:$0xf] %vm1119_vm4, %v1401_v61 }
 0x10e   : > { %1147 = vst.msk [vmem:[%s1769_s16 + $0x6c] sm:$0xf] %vm1119_vm4, %v1417_v62  ;;  %v1399_v55 = vpack.c.bf16 %v968_v63, %v968_v63  ;;  %v1415_v6 = vpack.c.bf16 %v984_v0, %v984_v0  ;;  %v903_v7 = vmul.f32 %v1746_v49, %v864_v59  ;;  %v919_v8 = vmul.f32 %v1746_v49, %v880_v60 }
 0x10f   : > { %v973_v9 = vmax.f32 %v941_v3, 0.0  ;;  %v989_v10 = vmax.f32 %v957_v4, 0.0  ;;  %v939_v1 = vadd.f32 %v1750_v56, %v900_v5  ;;  %v955_v2 = vadd.f32 %v1750_v56, %v916_v41 }
 0x110   : > { %1129 = vst.msk [vmem:[%s1769_s16 + $0x24] sm:$0xf] %vm1119_vm4, %v1399_v55  ;;  %1145 = vst.msk [vmem:[%s1769_s16 + $0x64] sm:$0xf] %vm1119_vm4, %v1415_v6  ;;  %v942_v11 = vadd.f32 %v1750_v56, %v903_v7  ;;  %v958_v12 = vadd.f32 %v1750_v56, %v919_v8  ;;  %v901_v13 = vmul.f32 %v1746_v49, %v862_v42 }
 0x111   : > { %v917_v14 = vmul.f32 %v1746_v49, %v878_v54  ;;  %v1404_v15 = vpack.c.bf16 %v973_v9, %v973_v9  ;;  %v1420_v16 = vpack.c.bf16 %v989_v10, %v989_v10  ;;  %v971_v17 = vmax.f32 %v939_v1, 0.0 }
 0x112   : > { %v987_v18 = vmax.f32 %v955_v2, 0.0  ;;  %v974_v19 = vmax.f32 %v942_v11, 0.0  ;;  %v990_v20 = vmax.f32 %v958_v12, 0.0  ;;  %v940_v21 = vadd.f32 %v1750_v56, %v901_v13 }
 0x113   : > { %v956_v22 = vadd.f32 %v1750_v56, %v917_v14  ;;  %1134 = vst.msk [vmem:[%s1769_s16 + $0x38] sm:$0xf] %vm1119_vm4, %v1404_v15  ;;  %1150 = vst.msk [vmem:[%s1769_s16 + $0x78] sm:$0xf] %vm1119_vm4, %v1420_v16  ;;  %v1402_v49 = vpack.c.bf16 %v971_v17, %v971_v17 }
 0x114   : > { %v1418_v23 = vpack.c.bf16 %v987_v18, %v987_v18  ;;  %v1405_v24 = vpack.c.bf16 %v974_v19, %v974_v19  ;;  %v1421_v25 = vpack.c.bf16 %v990_v20, %v990_v20  ;;  %v972_v26 = vmax.f32 %v940_v21, 0.0 }
 0x115   : > { %v988_v27 = vmax.f32 %v956_v22, 0.0  ;;  %1132 = vst.msk [vmem:[%s1769_s16 + $0x30] sm:$0xf] %vm1119_vm4, %v1402_v49 }
 0x116   : > { %1148 = vst.msk [vmem:[%s1769_s16 + $0x70] sm:$0xf] %vm1119_vm4, %v1418_v23  ;;  %1135 = vst.msk [vmem:[%s1769_s16 + $0x3c] sm:$0xf] %vm1119_vm4, %v1405_v24  ;;  %v1403_v56 = vpack.c.bf16 %v972_v26, %v972_v26 }
 0x117   : > { %1151 = vst.msk [vmem:[%s1769_s16 + $0x7c] sm:$0xf] %vm1119_vm4, %v1421_v25  ;;  %v1419_v28 = vpack.c.bf16 %v988_v27, %v988_v27 }
 0x118   : > { %1133 = vst.msk [vmem:[%s1769_s16 + $0x34] sm:$0xf] %vm1119_vm4, %v1403_v56 }
 0x119   : > { %1149 = vst.msk [vmem:[%s1769_s16 + $0x74] sm:$0xf] %vm1119_vm4, %v1419_v28 }
 0x11a PF: > { %s14_s19 = sadd.s32 1, %s1578_s19   ;;  %s1956_s15 = smov %s1570_s17 }
 0x11b   : > { %p11_p7 = scmp.ge.s32.totalorder %s14_s19, 14   ;;  %s1957_s16 = smov %s1574_s18 }
 0x11c   : > { %s1958_s17 = smov %s1961_s20  ;;  %s1959_s18 = smov %s1965_s21 }
 0x11d   :  { %13 = sbr.rel (!%p11_p7) target bundleno = 3 (0x3), region = 83 }

</bundles_post_ra>
